<compile_context>
chip_gen: v7x
topology: tpu7x:2x2x1
jax: 0.10.0
libtpu: 0.0.40
codegen_flags: <defaults>
</compile_context>

<pallas_src>
import functools

import jax
import jax.numpy as jnp
from jax.experimental import pallas as pl
from jax.experimental.pallas import tpu as pltpu

SUBLANE = 16  # sublane granularity (covers bf16 packing of the x stream)


def _round_up(n, m):
    return ((n + m - 1) // m) * m


def mlp_kernel(x_ref, w1_ref, b1_ref, w2_ref, b2_ref, w3_ref, b3_ref, o_ref):
    # x arrives as bf16 (halved HBM read traffic); all compute is f32.
    x = x_ref[...].astype(jnp.float32)
    # hidden1 + ReLU
    h1 = jnp.dot(x, w1_ref[...], preferred_element_type=jnp.float32)
    h1 = jnp.maximum(h1 + b1_ref[...], 0.0)
    # hidden2 + ReLU
    h2 = jnp.dot(h1, w2_ref[...], preferred_element_type=jnp.float32)
    h2 = jnp.maximum(h2 + b2_ref[...], 0.0)
    # hidden3 (no activation)
    out = jnp.dot(h2, w3_ref[...], preferred_element_type=jnp.float32)
    o_ref[...] = (out + b3_ref[...]).astype(o_ref.dtype)


def _mlp_forward(x, params, *, tile_b=2048, x_dtype=jnp.bfloat16):
    """x: (B, n_inputs) f32; params stored as (in, out) weights + (1, out) biases."""
    w1, b1, w2, b2, w3, b3 = params
    B, n_in = x.shape
    n_classes = w3.shape[1]

    # Batch tile: at least 2 grid steps when possible (keeps both v7x TCs busy),
    # capped at tile_b. VMEM per step at tb=2048 (x block + out block + f32
    # temporaries, x2 pipeline buffers) is a few MiB -> safe on all generations.
    tb = min(tile_b, max(SUBLANE, _round_up(pl.cdiv(B, 2), SUBLANE)))
    b_pad = _round_up(B, tb)
    grid = (b_pad // tb,)

    # Batch-pad rows only if needed (feature dims keep their real width), then
    # cast the activation stream to bf16. Padded rows compute relu(bias) junk
    # that is sliced off below; zero feature columns never exist anymore.
    x_p = x if b_pad == B else jnp.pad(x, ((0, b_pad - B), (0, 0)))
    x_p = x_p.astype(x_dtype)

    def resident(a):
        # Full-array block, same block index at every grid point -> weights and
        # biases are DMA'd into VMEM once and stay resident across the batch loop.
        return pl.BlockSpec(a.shape, lambda i: (0, 0))

    flops = 2 * B * (n_in * w1.shape[1] + w1.shape[1] * w2.shape[1] + w2.shape[1] * n_classes)
    bytes_accessed = int(
        x_p.size * x_p.dtype.itemsize
        + sum(a.size * a.dtype.itemsize for a in (w1, b1, w2, b2, w3, b3))
        + b_pad * n_classes * 4
    )

    out = pl.pallas_call(
        mlp_kernel,
        out_shape=jax.ShapeDtypeStruct((b_pad, n_classes), jnp.float32),
        grid=grid,
        in_specs=[
            # Activation stream, tiled over batch, real (unpadded) last dim.
            # TODO(synk): add pipeline_mode=pl.Buffered(3) here if profiling
            # shows exposed DMA latency from the narrow per-row copies.
            pl.BlockSpec((tb, n_in), lambda i: (i, 0)),
            resident(w1),
            resident(b1),
            resident(w2),
            resident(b2),
            resident(w3),
            resident(b3),
        ],
        # Narrow output block (contiguous in HBM since the array is (b_pad, nc)).
        # TODO(synk): if the 4 B/row store shows up as descriptor-bound, emit a
        # lane-dense transposed (n_classes, tb) tile + wrapper reshape instead.
        out_specs=pl.BlockSpec((tb, n_classes), lambda i: (i, 0)),
        compiler_params=pltpu.CompilerParams(
            dimension_semantics=("parallel",),  # 2-TC sharding on v7x; free elsewhere
        ),
        cost_estimate=pl.CostEstimate(
            flops=flops, transcendentals=0, bytes_accessed=bytes_accessed
        ),
    )(x_p, w1, b1, w2, b2, w3, b3)

    # Drop batch-padding rows (no column slice needed anymore).
    return out[:B]


mlp_forward = functools.partial(
    jax.jit(_mlp_forward, static_argnames=("tile_b", "x_dtype"))
)


def xavier_uniform(key, fan_in, fan_out):
    # matches torch.nn.init.xavier_uniform_ (gain=1); stored as (in, out) for X @ W
    limit = jnp.sqrt(6.0 / (fan_in + fan_out))
    return jax.random.uniform(key, (fan_in, fan_out), jnp.float32, -limit, limit)


def linear_default_bias(key, fan_in, fan_out):
    # torch Linear default bias init: U(-1/sqrt(fan_in), 1/sqrt(fan_in))
    bound = 1.0 / jnp.sqrt(float(fan_in))
    return jax.random.uniform(key, (1, fan_out), jnp.float32, -bound, bound)


def init_params(key, n_inputs, n_classes):
    k = jax.random.split(key, 6)
    w1 = xavier_uniform(k[0], n_inputs, 10)
    b1 = linear_default_bias(k[1], n_inputs, 10)
    w2 = xavier_uniform(k[2], 10, 8)
    b2 = linear_default_bias(k[3], 10, 8)
    w3 = xavier_uniform(k[4], 8, n_classes)
    b3 = linear_default_bias(k[5], 8, n_classes)
    return (w1, b1, w2, b2, w3, b3)


def mlp_reference(x, params):
    w1, b1, w2, b2, w3, b3 = params
    h1 = jnp.maximum(x @ w1 + b1, 0.0)
    h2 = jnp.maximum(h1 @ w2 + b2, 0.0)
    return h2 @ w3 + b3


if __name__ == "__main__":
    # Regression-style MLP (e.g. Boston housing): 13 inputs -> 1 output.
    B, n_inputs, n_classes = 8, 13, 1
    key = jax.random.PRNGKey(0)
    kx, kp = jax.random.split(key)
    x = jax.random.normal(kx, (B, n_inputs), jnp.float32)
    params = init_params(kp, n_inputs, n_classes)

    out = jax.block_until_ready(mlp_forward(x, params))
    assert out.shape == (B, n_classes)

    # Kernel-numerics check: same bf16-rounded activations, f32 math.
    x_r = x.astype(jnp.bfloat16).astype(jnp.float32)
    assert jnp.allclose(out, mlp_reference(x_r, params), atol=2e-3, rtol=2e-3)
    # Semantic check vs the full-f32 PyTorch forward (bf16 activation tolerance).
    assert jnp.allclose(out, mlp_reference(x, params), atol=5e-2, rtol=5e-2)

    # Multi-grid-step path (non-multiple batch, 2 grid steps).
    B2 = 1030
    x2 = jax.random.normal(jax.random.PRNGKey(1), (B2, n_inputs), jnp.float32)
    out2 = jax.block_until_ready(mlp_forward(x2, params))
    assert out2.shape == (B2, n_classes)
    x2_r = x2.astype(jnp.bfloat16).astype(jnp.float32)
    assert jnp.allclose(out2, mlp_reference(x2_r, params), atol=2e-3, rtol=2e-3)
    assert jnp.allclose(out2, mlp_reference(x2, params), atol=5e-2, rtol=5e-2)

    print("KERNEL_OK")
</pallas_src>

<mosaic_0001>
module attributes {stable_mosaic.version = 11 : i64} {
  func.func @mlp_kernel(%arg0: i32, %arg1: memref<16x13xbf16, #tpu.memory_space<vmem>>, %arg2: memref<13x10xf32, #tpu.memory_space<vmem>>, %arg3: memref<1x10xf32, #tpu.memory_space<vmem>>, %arg4: memref<10x8xf32, #tpu.memory_space<vmem>>, %arg5: memref<1x8xf32, #tpu.memory_space<vmem>>, %arg6: memref<8x1xf32, #tpu.memory_space<vmem>>, %arg7: memref<1x1xf32, #tpu.memory_space<vmem>>, %arg8: memref<16x1xf32, #tpu.memory_space<vmem>>) attributes {dimension_semantics = [#tpu.dimension_semantics<parallel>], iteration_bounds = array<i64: 1>, scalar_prefetch = 0 : i64, scratch_operands = 0 : i64, tpu.core_type = #tpu.core_type<tc>, window_params = [{transform_indices = @transform_0, window_bounds = array<i64: 16, 13>}, {pipeline_mode = #tpu.pipeline_mode<synchronous>, transform_indices = @transform_1, window_bounds = array<i64: 13, 10>}, {pipeline_mode = #tpu.pipeline_mode<synchronous>, transform_indices = @transform_2, window_bounds = array<i64: 1, 10>}, {pipeline_mode = #tpu.pipeline_mode<synchronous>, transform_indices = @transform_3, window_bounds = array<i64: 10, 8>}, {pipeline_mode = #tpu.pipeline_mode<synchronous>, transform_indices = @transform_4, window_bounds = array<i64: 1, 8>}, {pipeline_mode = #tpu.pipeline_mode<synchronous>, transform_indices = @transform_5, window_bounds = array<i64: 8, 1>}, {pipeline_mode = #tpu.pipeline_mode<synchronous>, transform_indices = @transform_6, window_bounds = array<i64: 1, 1>}, {transform_indices = @transform_7, window_bounds = array<i64: 16, 1>}]} {
    %c0 = arith.constant 0 : index
    %c0_0 = arith.constant 0 : index
    %0 = vector.load %arg1[%c0, %c0_0] : memref<16x13xbf16, #tpu.memory_space<vmem>>, vector<16x13xbf16>
    %1 = arith.extf %0 : vector<16x13xbf16> to vector<16x13xf32>
    %c0_1 = arith.constant 0 : index
    %c0_2 = arith.constant 0 : index
    %2 = vector.load %arg2[%c0_1, %c0_2] : memref<13x10xf32, #tpu.memory_space<vmem>>, vector<13x10xf32>
    %cst = arith.constant dense<0.000000e+00> : vector<16x10xf32>
    %3 = tpu.matmul %1, %2, %cst {dimension_numbers = #tpu.dot_dimension_numbers<[1], [0], [0], [1], [0, 0, 1, 1], [], []>} : vector<16x13xf32>, vector<13x10xf32>, vector<16x10xf32> -> vector<16x10xf32>
    %c0_3 = arith.constant 0 : index
    %c0_4 = arith.constant 0 : index
    %4 = vector.load %arg3[%c0_3, %c0_4] : memref<1x10xf32, #tpu.memory_space<vmem>>, vector<1x10xf32>
    %5 = vector.broadcast %4 : vector<1x10xf32> to vector<16x10xf32>
    %6 = arith.addf %3, %5 : vector<16x10xf32>
    %cst_5 = arith.constant 0.000000e+00 : f32
    %7 = vector.broadcast %cst_5 : f32 to vector<16x10xf32>
    %8 = arith.maximumf %6, %7 : vector<16x10xf32>
    %c0_6 = arith.constant 0 : index
    %c0_7 = arith.constant 0 : index
    %9 = vector.load %arg4[%c0_6, %c0_7] : memref<10x8xf32, #tpu.memory_space<vmem>>, vector<10x8xf32>
    %cst_8 = arith.constant dense<0.000000e+00> : vector<16x8xf32>
    %10 = tpu.matmul %8, %9, %cst_8 {dimension_numbers = #tpu.dot_dimension_numbers<[1], [0], [0], [1], [0, 0, 1, 1], [], []>} : vector<16x10xf32>, vector<10x8xf32>, vector<16x8xf32> -> vector<16x8xf32>
    %c0_9 = arith.constant 0 : index
    %c0_10 = arith.constant 0 : index
    %11 = vector.load %arg5[%c0_9, %c0_10] : memref<1x8xf32, #tpu.memory_space<vmem>>, vector<1x8xf32>
    %12 = vector.broadcast %11 : vector<1x8xf32> to vector<16x8xf32>
    %13 = arith.addf %10, %12 : vector<16x8xf32>
    %cst_11 = arith.constant 0.000000e+00 : f32
    %14 = vector.broadcast %cst_11 : f32 to vector<16x8xf32>
    %15 = arith.maximumf %13, %14 : vector<16x8xf32>
    %c0_12 = arith.constant 0 : index
    %c0_13 = arith.constant 0 : index
    %16 = vector.load %arg6[%c0_12, %c0_13] : memref<8x1xf32, #tpu.memory_space<vmem>>, vector<8x1xf32>
    %cst_14 = arith.constant dense<0.000000e+00> : vector<16x1xf32>
    %17 = tpu.matmul %15, %16, %cst_14 {dimension_numbers = #tpu.dot_dimension_numbers<[1], [0], [0], [1], [0, 0, 1, 1], [], []>} : vector<16x8xf32>, vector<8x1xf32>, vector<16x1xf32> -> vector<16x1xf32>
    %c0_15 = arith.constant 0 : index
    %c0_16 = arith.constant 0 : index
    %18 = vector.load %arg7[%c0_15, %c0_16] : memref<1x1xf32, #tpu.memory_space<vmem>>, vector<1x1xf32>
    %19 = vector.broadcast %18 : vector<1x1xf32> to vector<16x1xf32>
    %20 = arith.addf %17, %19 : vector<16x1xf32>
    %c0_17 = arith.constant 0 : index
    %c0_18 = arith.constant 0 : index
    %21 = vector.load %arg8[%c0_17, %c0_18] : memref<16x1xf32, #tpu.memory_space<vmem>>, vector<16x1xf32>
    tpu.vector_store %arg8[%c0_17, %c0_18], %20 {strides = array<i32>} : memref<16x1xf32, #tpu.memory_space<vmem>>, vector<16x1xf32>,
    return
  }
  func.func @transform_0(%arg0: i32) -> (i32, i32) {
    %c0_i32 = arith.constant 0 : i32
    %c0_i32_0 = arith.constant 0 : i32
    return %arg0, %c0_i32 : i32, i32
  }
  func.func @transform_1(%arg0: i32) -> (i32, i32) {
    %c0_i32 = arith.constant 0 : i32
    %c0_i32_0 = arith.constant 0 : i32
    %c0_i32_1 = arith.constant 0 : i32
    return %c0_i32, %c0_i32_0 : i32, i32
  }
  func.func @transform_2(%arg0: i32) -> (i32, i32) {
    %c0_i32 = arith.constant 0 : i32
    %c0_i32_0 = arith.constant 0 : i32
    %c0_i32_1 = arith.constant 0 : i32
    return %c0_i32, %c0_i32_0 : i32, i32
  }
  func.func @transform_3(%arg0: i32) -> (i32, i32) {
    %c0_i32 = arith.constant 0 : i32
    %c0_i32_0 = arith.constant 0 : i32
    %c0_i32_1 = arith.constant 0 : i32
    return %c0_i32, %c0_i32_0 : i32, i32
  }
  func.func @transform_4(%arg0: i32) -> (i32, i32) {
    %c0_i32 = arith.constant 0 : i32
    %c0_i32_0 = arith.constant 0 : i32
    %c0_i32_1 = arith.constant 0 : i32
    return %c0_i32, %c0_i32_0 : i32, i32
  }
  func.func @transform_5(%arg0: i32) -> (i32, i32) {
    %c0_i32 = arith.constant 0 : i32
    %c0_i32_0 = arith.constant 0 : i32
    %c0_i32_1 = arith.constant 0 : i32
    return %c0_i32, %c0_i32_0 : i32, i32
  }
  func.func @transform_6(%arg0: i32) -> (i32, i32) {
    %c0_i32 = arith.constant 0 : i32
    %c0_i32_0 = arith.constant 0 : i32
    %c0_i32_1 = arith.constant 0 : i32
    return %c0_i32, %c0_i32_0 : i32, i32
  }
  func.func @transform_7(%arg0: i32) -> (i32, i32) {
    %c0_i32 = arith.constant 0 : i32
    %c0_i32_0 = arith.constant 0 : i32
    return %arg0, %c0_i32 : i32, i32
  }
}

</mosaic_0001>

<bundles_post_ra>
// kernel: _mlp_forward.1
= control target key start
LH: loop header
LB: loop body
LE: loop exit
PB: predicated region body
PF: predicated region fallthrough
CT: control target
= control target key end

     0   :  { %vm48_vm0 = vcmask 1044480   ;;  %vm381_vm1 = vmmov 1   ;;  %vm41_vm3 = vcmask 105472   ;;  %vm145_vm4 = vcmask 1041408   ;;  %s457_s1 = inlined_call_operand.vmem [shape: f32[13,10], index: 1, kind: input, shape index: {}]   ;;  %s458_s0 = inlined_call_operand.vmem [shape: bf16[16,13], index: 0, kind: input, shape index: {}]   ;;  %s459_s3 = inlined_call_operand.vmem [shape: f32[10,8], index: 3, kind: input, shape index: {}]   ;;  %s460_s2 = inlined_call_operand.vmem [shape: f32[1,10], index: 2, kind: input, shape index: {}]   ;;  %s461_s5 = inlined_call_operand.vmem [shape: f32[8,1], index: 5, kind: input, shape index: {}]   ;;  %s462_s6 = inlined_call_operand.<no memory space> [shape: f32[1,1], index: 6, kind: input, shape index: {}]   ;;  %s463_s4 = inlined_call_operand.vmem [shape: f32[1,8], index: 4, kind: input, shape index: {}]   ;;  %s464_s7 = inlined_call_operand.vmem [shape: f32[16,1], index: 7, kind: output, shape index: {}]  }
   0x1   :  { %v32_v0 = vld [vmem:[%s457_s1] sm:$0xff]  ;;  %v33_v1 = vld [vmem:[%s457_s1 + $0x8] sm:$0x1f]  ;;  %vm369_vm2 = vmpackc.low %vm48_vm0, %vm381_vm1  ;;  %vm138_vm6 = vcmask 80896   ;;  %v12_v17 = vstv %s462_s6  ;;  %vm234_vm7 = vcmask 64512   ;;  %vm316_vm8 = vcmask 7168  }
   0x2   :  { %v368_v2 = vpack.c.bf16 %v33_v1, %v32_v0  ;;  %v335_v3 = vld [vmem:[%s458_s0] sm:$0xff]   ;;  %v130_v7 = vld [vmem:[%s459_s3 + $0x8] sm:$0x3]  ;;  %vm375_vm5 = vmpackc.low %vm145_vm4, %vm381_vm1  ;;  %13 = vst [vmem:[#allocation2] sm:$0x1] %v12_v17 }
   0x3   :  { %v336_v4 = vunpack.c.l.bf16 %v335_v3  ;;  %v337_v5 = vunpack.c.h.bf16 %v335_v3  ;;  %v129_v6 = vld [vmem:[%s459_s3] sm:$0xff] }
   0x4   :  { %370 = vmatprep.subr.msk.bf16.mxu0 %vm369_vm2, %v368_v2  ;;  %v374_v8 = vpack.c.bf16 %v130_v7, %v129_v6  ;;  %v323_v9 = vld [vmem:[%s460_s2] ss:$0 sm:$0xff] }
   0x5   :  { %373 = vmatpush3.bf16.msk.msra.mxu0 %vm369_vm2, %v368_v2  ;;  %353 = vmatprep.mubr.msk.f32.mxu0 %vm41_vm3, %v336_v4  ;;  %v226_v16 = vld [vmem:[%s461_s5] sm:$0xff] }
   0x6   :  { %376 = vmatprep.subr.msk.bf16.mxu1 %vm375_vm5, %v374_v8  ;;  %363 = vmatprep.subr.mxu0 %v226_v16  ;;  %v327_v18 = vld [vmem:[%s463_s4] ss:$0 sm:$0xff] }
   0x7   :  { %379 = vmatpush3.bf16.msk.msra.mxu1 %vm375_vm5, %v374_v8 }
   0x8   :  { %354 = vmatmul.mubr.msk.f32.vlgmr.msra.gmra.mrb[0].mxu0 %vm41_vm3, %v337_v5 }
   0x9   :  { %364 = vmatpush3.msra.mxu0 %v226_v16  ;;  %v331_v25 = vld [vmem:[#allocation2] ss:$0 sm:$0xff] }
  0xdb   :  { %v355_v10 = vpop.f32.mrb[0].mxu0 }
  0xdc   :  { %v124_v11 = vadd.f32 %v355_v10, %v323_v9  ;;  %v118_v12 = vpop.f32.mrb[1].mxu0 }
  0xdd   :  { %v119_v13 = vadd.f32 %v323_v9, %v118_v12 }
  0xde   :  { %v128_v15 = vmax.f32 %v124_v11, 0.0 }
  0xdf   :  { %v127_v14 = vmax.f32 %v119_v13, 0.0 }
  0xe1   :  { %360 = vmatprep.mubr.msk.f32.mxu1 %vm138_vm6, %v127_v14 }
  0xe2   :  { %361 = vmatmul.mubr.msk.f32.vlgmr.msra.gmra.mrb[0].mxu1 %vm138_vm6, %v128_v15 }
 0x1b5   :  { %v362_v19 = vpop.f32.mrb[0].mxu1 }
 0x1b6   :  { %v221_v20 = vadd.f32 %v362_v19, %v327_v18  ;;  %v215_v21 = vpop.f32.mrb[1].mxu1 }
 0x1b7   :  { %v216_v22 = vadd.f32 %v327_v18, %v215_v21 }
 0x1b8   :  { %v225_v24 = vmax.f32 %v221_v20, 0.0 }
 0x1b9   :  { %v224_v23 = vmax.f32 %v216_v22, 0.0 }
 0x1bb   :  { %365 = vmatprep.mubr.msk.f32.mxu0 %vm234_vm7, %v224_v23 }
 0x1bc   :  { %366 = vmatmul.mubr.msk.f32.vlgmr.msra.gmra.mrb[2].mxu0 %vm234_vm7, %v225_v24 }
 0x28f   :  { %v367_v26 = vpop.f32.mrb[2].mxu0 }
 0x290   :  { %v313_v27 = vadd.f32 %v367_v26, %v331_v25  ;;  %v307_v28 = vpop.f32.mrb[3].mxu0 }
 0x291   :  { %v308_v29 = vadd.f32 %v331_v25, %v307_v28 }
 0x292   :  { %318 = vst.msk [vmem:[%s464_s7 + $0x8] sm:$0xff] %vm316_vm8, %v313_v27 }
 0x293   :  { %317 = vst.msk [vmem:[%s464_s7] sm:$0xff] %vm316_vm8, %v308_v29 }

</bundles_post_ra>
